<compile_context>
chip_gen: v6e
topology: v6e:2x2x1
jax: 0.10.0
libtpu: 0.0.40
codegen_flags: <defaults>
</compile_context>

<pallas_src>
import functools

import jax
import jax.numpy as jnp
from jax.experimental import pallas as pl
from jax.experimental.pallas import tpu as pltpu


def _round_up(x: int, m: int) -> int:
    return ((x + m - 1) // m) * m


def linear_relu_kernel(x_ref, w_ref, b_ref, o_ref, *, k_size, block_k,
                       dot_precision):
    """One (tm, tn) output tile, accumulated in-place over the K grid axis."""
    k = pl.program_id(2)

    @pl.when(k == 0)
    def _():
        o_ref[...] = jnp.zeros_like(o_ref)

    x = x_ref[...]
    w = w_ref[...]

    # K-tail masking (static decision): when tk does not divide K, the final K
    # block reads unspecified out-of-bounds values in both operands; zero them
    # so they contribute nothing to valid outputs.  M/N overreads only affect
    # output rows/cols that Pallas drops, so they need no handling.
    if k_size % block_k != 0:
        valid = k_size - k * block_k
        kx = jax.lax.broadcasted_iota(jnp.int32, x.shape, 1)
        kw = jax.lax.broadcasted_iota(jnp.int32, w.shape, 0)
        x = jnp.where(kx < valid, x, 0)
        w = jnp.where(kw < valid, w, 0)

    # MXU matmul of the (tm, tk) x (tk, tn) slices, f32 accumulation into the
    # K-resident output block.
    o_ref[...] += jnp.dot(x, w, preferred_element_type=jnp.float32,
                          precision=dot_precision)

    # Epilogue only on the last K step: bias add + ReLU (in place).
    @pl.when(k == pl.num_programs(2) - 1)
    def _():
        o_ref[...] = jnp.maximum(o_ref[...] + b_ref[...], 0.0)


@functools.partial(jax.jit, static_argnames=("tm", "tn", "tk", "compute_dtype"))
def my_linear(x, weight, bias, *, tm=1024, tn=1024, tk=512,
              compute_dtype=jnp.bfloat16):
    """x: (M, K), weight: (K, N), bias: (N,) -> relu(x @ weight + bias)."""
    M, K = x.shape
    K2, N = weight.shape
    assert K == K2 and bias.shape == (N,)

    # Shrink tiles to the (8, 128)-aligned problem size.  No wrapper padding.
    tm = min(tm, _round_up(M, 8))
    tn = min(tn, _round_up(N, 128))
    tk = min(tk, _round_up(K, 128))

    # v7x megacore: the (i, j) axes are "parallel" and sharded across the two
    # TensorCores; make sure there are >= 2 blocks whenever the shape allows.
    if pl.cdiv(M, tm) == 1 and pl.cdiv(N, tn) == 1:
        if N > 128:
            tn = _round_up(pl.cdiv(N, 2), 128)
        elif M > 8:
            tm = _round_up(pl.cdiv(M, 2), 8)

    grid = (pl.cdiv(M, tm), pl.cdiv(N, tn), pl.cdiv(K, tk))

    # bf16 operands (MXU-native), f32 bias / accumulation / output.
    xc = x.astype(compute_dtype)
    wc = weight.astype(compute_dtype)
    b2 = bias.astype(jnp.float32).reshape(1, N)
    in_itemsize = jnp.dtype(compute_dtype).itemsize
    dot_precision = (jax.lax.Precision.HIGHEST
                     if compute_dtype == jnp.float32 else None)

    # VMEM budget: double-buffered X/W/bias input tiles + K-resident f32
    # output tile (double-buffered across (i, j)).  Cap at 48 MiB (v7x-safe),
    # floor at 32 MiB for headroom.
    vmem_bytes = (2 * (tm * tk + tk * tn) * in_itemsize
                  + 2 * tm * tn * 4 + 2 * tn * 4)
    vmem_limit = min(max(int(vmem_bytes * 3) // 2, 32 << 20), 48 << 20)

    kernel = functools.partial(linear_relu_kernel, k_size=K, block_k=tk,
                               dot_precision=dot_precision)

    out = pl.pallas_call(
        kernel,
        out_shape=jax.ShapeDtypeStruct((M, N), jnp.float32),
        grid_spec=pltpu.PrefetchScalarGridSpec(
            num_scalar_prefetch=0,
            grid=grid,
            in_specs=[
                pl.BlockSpec((tm, tk), lambda i, j, k: (i, k)),   # X slice
                pl.BlockSpec((tk, tn), lambda i, j, k: (k, j)),   # W slice
                pl.BlockSpec((1, tn), lambda i, j, k: (0, j)),    # bias slice
            ],
            # Same output block across K -> stays VMEM-resident (accumulator),
            # written back once per (i, j).
            out_specs=pl.BlockSpec((tm, tn), lambda i, j, k: (i, j)),
        ),
        compiler_params=pltpu.CompilerParams(
            dimension_semantics=("parallel", "parallel", "arbitrary"),
            vmem_limit_bytes=vmem_limit,
        ),
        cost_estimate=pl.CostEstimate(
            flops=2 * M * K * N,
            transcendentals=0,
            bytes_accessed=(M * K + K * N) * in_itemsize + (M * N + N) * 4,
        ),
    )(xc, wc, b2)

    return out.astype(x.dtype)


if __name__ == "__main__":
    key = jax.random.PRNGKey(0)
    k_x, k_w, k_b, k_x2, k_w2, k_b2 = jax.random.split(key, 6)

    # Small shapes implied by the module (toy MyLinear layer).
    batch, in_units, units = 8, 32, 64
    x = jax.random.normal(k_x, (batch, in_units), dtype=jnp.float32)
    weight = jax.random.normal(k_w, (in_units, units), dtype=jnp.float32)
    bias = jax.random.normal(k_b, (units,), dtype=jnp.float32)

    out = my_linear(x, weight, bias)
    jax.block_until_ready(out)
    assert out.shape == (batch, units) and out.dtype == jnp.float32

    # Kernel-exact reference (same bf16 operands, f32 accumulation).
    ref_bf16 = jnp.maximum(
        jnp.dot(x.astype(jnp.bfloat16), weight.astype(jnp.bfloat16),
                preferred_element_type=jnp.float32) + bias, 0.0)
    assert jnp.allclose(out, ref_bf16, atol=1e-3, rtol=1e-3)
    # Sanity vs. full-f32 torch semantics (bf16 operand rounding only).
    ref_f32 = jnp.maximum(x @ weight + bias, 0.0)
    assert jnp.allclose(out, ref_f32, atol=5e-2, rtol=5e-2)

    # Multi-tile check: exercises the (i, j, k) grid and K-resident accumulation.
    M2, K2, N2 = 256, 384, 512
    x2 = jax.random.normal(k_x2, (M2, K2), dtype=jnp.float32)
    w2 = jax.random.normal(k_w2, (K2, N2), dtype=jnp.float32)
    b2 = jax.random.normal(k_b2, (N2,), dtype=jnp.float32)
    out2 = my_linear(x2, w2, b2, tm=128, tn=128, tk=128)
    jax.block_until_ready(out2)
    ref2 = jnp.maximum(
        jnp.dot(x2.astype(jnp.bfloat16), w2.astype(jnp.bfloat16),
                preferred_element_type=jnp.float32) + b2, 0.0)
    assert jnp.allclose(out2, ref2, atol=1e-2, rtol=1e-2)

    # Ragged-K check (K % tk != 0): exercises the in-kernel K-tail mask with no
    # wrapper-side padding.
    M3, K3, N3 = 64, 200, 256
    x3 = jax.random.normal(k_x, (M3, K3), dtype=jnp.float32)
    w3 = jax.random.normal(k_w, (K3, N3), dtype=jnp.float32)
    b3 = jax.random.normal(k_b, (N3,), dtype=jnp.float32)
    out3 = my_linear(x3, w3, b3, tm=64, tn=128, tk=128)
    jax.block_until_ready(out3)
    ref3 = jnp.maximum(
        jnp.dot(x3.astype(jnp.bfloat16), w3.astype(jnp.bfloat16),
                preferred_element_type=jnp.float32) + b3, 0.0)
    assert jnp.allclose(out3, ref3, atol=1e-2, rtol=1e-2)

    print("KERNEL_OK")
</pallas_src>

<mosaic_0001>
module attributes {stable_mosaic.version = 11 : i64} {
  func.func @linear_relu_kernel(%arg0: i32, %arg1: i32, %arg2: i32, %arg3: memref<8x128xbf16, #tpu.memory_space<vmem>>, %arg4: memref<128x128xbf16, #tpu.memory_space<vmem>>, %arg5: memref<1x128xf32, #tpu.memory_space<vmem>>, %arg6: memref<8x128xf32, #tpu.memory_space<vmem>>) attributes {dimension_semantics = [#tpu.dimension_semantics<parallel>, #tpu.dimension_semantics<parallel>, #tpu.dimension_semantics<arbitrary>], iteration_bounds = array<i64: 1, 1, 1>, scalar_prefetch = 0 : i64, scratch_operands = 0 : i64, tpu.core_type = #tpu.core_type<tc>, window_params = [{transform_indices = @transform_0, window_bounds = array<i64: 8, 128>}, {transform_indices = @transform_1, window_bounds = array<i64: 128, 128>}, {transform_indices = @transform_2, window_bounds = array<i64: 1, 128>}, {transform_indices = @transform_3, window_bounds = array<i64: 8, 128>}]} {
    %c0_i32 = arith.constant 0 : i32
    %0 = arith.cmpi eq, %arg2, %c0_i32 : i32
    %1 = arith.extui %0 : i1 to i32
    %c0_i32_0 = arith.constant 0 : i32
    %2 = arith.cmpi ne, %1, %c0_i32_0 : i32
    scf.if %2 {
      %cst_12 = arith.constant 0.000000e+00 : f32
      %26 = vector.broadcast %cst_12 : f32 to vector<8x128xf32>
      %c0_13 = arith.constant 0 : index
      %c0_14 = arith.constant 0 : index
      %27 = vector.load %arg6[%c0_13, %c0_14] : memref<8x128xf32, #tpu.memory_space<vmem>>, vector<8x128xf32>
      tpu.vector_store %arg6[%c0_13, %c0_14], %26 {strides = array<i32>} : memref<8x128xf32, #tpu.memory_space<vmem>>, vector<8x128xf32>,
    } else {
    }
    %c0 = arith.constant 0 : index
    %c0_1 = arith.constant 0 : index
    %3 = vector.load %arg3[%c0, %c0_1] : memref<8x128xbf16, #tpu.memory_space<vmem>>, vector<8x128xbf16>
    %c0_2 = arith.constant 0 : index
    %c0_3 = arith.constant 0 : index
    %4 = vector.load %arg4[%c0_2, %c0_3] : memref<128x128xbf16, #tpu.memory_space<vmem>>, vector<128x128xbf16>
    %c128_i32 = arith.constant 128 : i32
    %5 = arith.muli %arg2, %c128_i32 : i32
    %c32_i32 = arith.constant 32 : i32
    %6 = arith.subi %c32_i32, %5 : i32
    %7 = tpu.iota {dimensions = array<i32: 1>} : vector<8x128xi32>
    %8 = tpu.iota {dimensions = array<i32: 0>} : vector<128x128xi32>
    %9 = vector.broadcast %6 : i32 to vector<8x128xi32>
    %10 = arith.cmpi slt, %7, %9 : vector<8x128xi32>
    %c0_i32_4 = arith.constant 0 : i32
    %11 = arith.sitofp %c0_i32_4 : i32 to bf16
    %12 = vector.broadcast %11 : bf16 to vector<8x128xbf16>
    %13 = arith.select %10, %3, %12 : vector<8x128xi1>, vector<8x128xbf16>
    %14 = vector.broadcast %6 : i32 to vector<128x128xi32>
    %15 = arith.cmpi slt, %8, %14 : vector<128x128xi32>
    %c0_i32_5 = arith.constant 0 : i32
    %16 = arith.sitofp %c0_i32_5 : i32 to bf16
    %17 = vector.broadcast %16 : bf16 to vector<128x128xbf16>
    %18 = arith.select %15, %4, %17 : vector<128x128xi1>, vector<128x128xbf16>
    %c0_6 = arith.constant 0 : index
    %c0_7 = arith.constant 0 : index
    %19 = vector.load %arg6[%c0_6, %c0_7] : memref<8x128xf32, #tpu.memory_space<vmem>>, vector<8x128xf32>
    %cst = arith.constant dense<0.000000e+00> : vector<8x128xf32>
    %20 = tpu.matmul %13, %18, %cst {dimension_numbers = #tpu.dot_dimension_numbers<[1], [0], [0], [1], [0, 0, 1, 1], [], []>} : vector<8x128xbf16>, vector<128x128xbf16>, vector<8x128xf32> -> vector<8x128xf32>
    %21 = arith.addf %19, %20 : vector<8x128xf32>
    %c0_8 = arith.constant 0 : index
    %c0_9 = arith.constant 0 : index
    %22 = vector.load %arg6[%c0_8, %c0_9] : memref<8x128xf32, #tpu.memory_space<vmem>>, vector<8x128xf32>
    tpu.vector_store %arg6[%c0_8, %c0_9], %21 {strides = array<i32>} : memref<8x128xf32, #tpu.memory_space<vmem>>, vector<8x128xf32>,
    %c0_i32_10 = arith.constant 0 : i32
    %23 = arith.cmpi eq, %arg2, %c0_i32_10 : i32
    %24 = arith.extui %23 : i1 to i32
    %c0_i32_11 = arith.constant 0 : i32
    %25 = arith.cmpi ne, %24, %c0_i32_11 : i32
    scf.if %25 {
      %c0_12 = arith.constant 0 : index
      %c0_13 = arith.constant 0 : index
      %26 = vector.load %arg6[%c0_12, %c0_13] : memref<8x128xf32, #tpu.memory_space<vmem>>, vector<8x128xf32>
      %c0_14 = arith.constant 0 : index
      %c0_15 = arith.constant 0 : index
      %27 = vector.load %arg5[%c0_14, %c0_15] : memref<1x128xf32, #tpu.memory_space<vmem>>, vector<1x128xf32>
      %28 = vector.broadcast %27 : vector<1x128xf32> to vector<8x128xf32>
      %29 = arith.addf %26, %28 : vector<8x128xf32>
      %cst_16 = arith.constant 0.000000e+00 : f32
      %30 = vector.broadcast %cst_16 : f32 to vector<8x128xf32>
      %31 = arith.maximumf %29, %30 : vector<8x128xf32>
      %c0_17 = arith.constant 0 : index
      %c0_18 = arith.constant 0 : index
      %32 = vector.load %arg6[%c0_17, %c0_18] : memref<8x128xf32, #tpu.memory_space<vmem>>, vector<8x128xf32>
      tpu.vector_store %arg6[%c0_17, %c0_18], %31 {strides = array<i32>} : memref<8x128xf32, #tpu.memory_space<vmem>>, vector<8x128xf32>,
    } else {
    }
    return
  }
  func.func @transform_0(%arg0: i32, %arg1: i32, %arg2: i32) -> (i32, i32) {
    %c0_i32 = arith.constant 0 : i32
    return %arg0, %arg2 : i32, i32
  }
  func.func @transform_1(%arg0: i32, %arg1: i32, %arg2: i32) -> (i32, i32) {
    %c0_i32 = arith.constant 0 : i32
    return %arg2, %arg1 : i32, i32
  }
  func.func @transform_2(%arg0: i32, %arg1: i32, %arg2: i32) -> (i32, i32) {
    %c0_i32 = arith.constant 0 : i32
    %c0_i32_0 = arith.constant 0 : i32
    return %c0_i32, %arg1 : i32, i32
  }
  func.func @transform_3(%arg0: i32, %arg1: i32, %arg2: i32) -> (i32, i32) {
    %c0_i32 = arith.constant 0 : i32
    return %arg0, %arg1 : i32, i32
  }
}

</mosaic_0001>

<bundles_post_ra>
// kernel: my_linear.1
= control target key start
LH: loop header
LB: loop body
LE: loop exit
PB: predicated region body
PF: predicated region fallthrough
CT: control target
= control target key end

     0   :  { %v294_v2 = vmov 0.0   ;;  %vm295_vm0 = vmmov 0   ;;  %s415_s0 = inlined_call_operand.vmem [shape: bf16[8,32], index: 0, kind: input, shape index: {}]   ;;  %s416_s1 = inlined_call_operand.vmem [shape: bf16[32,64], index: 1, kind: input, shape index: {}]   ;;  %s417_s2 = inlined_call_operand.vmem [shape: f32[1,64], index: 2, kind: input, shape index: {}]   ;;  %s418_s3 = inlined_call_operand.hbm [shape: f32[8,64], index: 3, kind: output, shape index: {}]  }
   0x1   :  { %v36_v0 = vld [vmem:[%s416_s1 + $0x38] sm:$0xf]  ;;  %v37_v1 = vld [vmem:[%s416_s1 + $0x3c] sm:$0xf]  ;;  %248 = vmatprep.subr.bf16.mxu0 %v294_v2  ;;  %vm324_vm1 = vmpackc.low %vm295_vm0, %vm295_vm0  ;;  %264 = vmatprep.mubr.msk.bf16.mxu0 %vm295_vm0, %v294_v2 }
   0x2   :  { %v34_v4 = vld [vmem:[%s416_s1 + $0x30] sm:$0xf]  ;;  %v35_v5 = vld [vmem:[%s416_s1 + $0x34] sm:$0xf]  ;;  %v109_v6 = vsel %vm324_vm1, %v36_v0, 0  ;;  %v110_v7 = vsel %vm324_vm1, %v37_v1, 0 }
   0x3   :  { %v107_v8 = vsel %vm324_vm1, %v34_v4, 0  ;;  %v108_v9 = vsel %vm324_vm1, %v35_v5, 0  ;;  %v237_v10 = vcombine.low %v109_v6, %v110_v7  ;;  %v32_v11 = vld [vmem:[%s416_s1 + $0x28] sm:$0xf]  ;;  %v33_v12 = vld [vmem:[%s416_s1 + $0x2c] sm:$0xf] }
   0x4   :  { %v236_v13 = vcombine.low %v107_v8, %v108_v9  ;;  %v105_v14 = vsel %vm324_vm1, %v32_v11, 0  ;;  %v106_v15 = vsel %vm324_vm1, %v33_v12, 0  ;;  %v30_v16 = vld [vmem:[%s416_s1 + $0x20] sm:$0xf]  ;;  %v31_v17 = vld [vmem:[%s416_s1 + $0x24] sm:$0xf] }
   0x5   :  { %249 = vmatpush3.bf16.msra.mxu0 %v237_v10  ;;  %v235_v18 = vcombine.low %v105_v14, %v106_v15 }
   0x6   :  { %250 = vmatprep.subr.bf16.mxu0 %v294_v2 }
   0x9   :  { %251 = vmatpush3.bf16.msra.mxu0 %v236_v13 }
   0xa   :  { %8 = vsyncpa [#allocation3], 0  ;;  %252 = vmatprep.subr.bf16.mxu0 %v294_v2  ;;  %v103_v19 = vsel %vm324_vm1, %v30_v16, 0  ;;  %v104_v20 = vsel %vm324_vm1, %v31_v17, 0  ;;  %v28_v21 = vld [vmem:[%s416_s1 + $0x18] sm:$0xf]  ;;  %v40_v34 = vlaneseq }
   0xb   :  { %v29_v22 = vld [vmem:[%s416_s1 + $0x1c] sm:$0xf]  ;;  %v234_v23 = vcombine.low %v103_v19, %v104_v20  ;;  %v101_v24 = vsel %vm324_vm1, %v28_v21, 0  ;;  %v26_v26 = vld [vmem:[%s416_s1 + $0x10] sm:$0xf]  ;;  %vm296_vm2 = vmmov 1  }
   0xc   :  { %v102_v25 = vsel %vm324_vm1, %v29_v22, 0  ;;  %v27_v27 = vld [vmem:[%s416_s1 + $0x14] sm:$0xf]  ;;  %v99_v29 = vsel %vm324_vm1, %v26_v26, 0  ;;  %v24_v31 = vld [vmem:[%s416_s1 + $0x8] sm:$0xf]  ;;  %vm388_vm3 = vmpackc.low %vm296_vm2, %vm296_vm2 }
   0xd   :  { %253 = vmatpush3.bf16.msra.mxu0 %v235_v18  ;;  %v233_v28 = vcombine.low %v101_v24, %v102_v25  ;;  %v100_v30 = vsel %vm324_vm1, %v27_v27, 0  ;;  %v25_v32 = vld [vmem:[%s416_s1 + $0xc] sm:$0xf]  ;;  %v97_v36 = vsel %vm388_vm3, %v24_v31, 0  ;;  %v22_v38 = vld [vmem:[%s416_s1] sm:$0xf] }
   0xe   :  { %254 = vmatprep.subr.bf16.mxu0 %v294_v2  ;;  %v232_v35 = vcombine.low %v99_v29, %v100_v30  ;;  %v98_v37 = vsel %vm388_vm3, %v25_v32, 0  ;;  %v23_v39 = vld [vmem:[%s416_s1 + $0x4] sm:$0xf]  ;;  %v41_v40 = vand.u32 127, %v40_v34  ;;  %v95_v42 = vsel %vm388_vm3, %v22_v38, 0  ;;  %s297_s20 = smov [#allocation2]  }
   0xf   :  { %v231_v41 = vcombine.low %v97_v36, %v98_v37  ;;  %v96_v43 = vsel %vm388_vm3, %v23_v39, 0  ;;  %v21_v45 = vld [vmem:[%s415_s0] sm:$0xf]  ;;  %s222_s21 = sshll.u32 %s297_s20, 4  ;;  %s223_s21 = int_to_ptr.vmem [resolvable:$true] %s222_s21 }
  0x10   :  { %vm60_vm4 = vcmp.lt.s32.totalorder %v41_v40, 32  ;;  %v230_v44 = vcombine.low %v95_v42, %v96_v43  ;;  %v238_v48 = vld [vmem:[%s417_s2] ss:$0 sm:$0xff]  ;;  %s272_s22 = scalar_lea.vmem %s223_s21, 128  ;;  %p277_p1 = scmp.lt.s32.totalorder %s223_s21, %s223_s21 }
  0x11   :  { %255 = vmatpush3.bf16.msra.mxu0 %v234_v23  ;;  %vm61_vm5 = vmpackc.low %vm60_vm4, %vm60_vm4  ;;  %p273_p0 = scmp.ne.s32.totalorder %s223_s21, %s272_s22  ;;  %p278_p2 = scmp.lt.s32.totalorder %s272_s22, %s272_s22 }
  0x12   :  { %256 = vmatprep.subr.bf16.mxu0 %v294_v2  ;;  %v62_v46 = vsel %vm61_vm5, %v21_v45, 0 }
  0x13   :  { %p279_p3 = por %p278_p2, %p277_p1 }
  0x15   :  { %257 = vmatpush3.bf16.msra.mxu0 %v233_v28  ;;  %p280_p4 = pnand %p279_p3, %p273_p0 }
  0x16   :  { %258 = vmatprep.subr.bf16.mxu0 %v294_v2 }
  0x19   :  { %259 = vmatpush3.bf16.msra.mxu0 %v232_v35 }
  0x1a   :  { %260 = vmatprep.subr.bf16.mxu0 %v294_v2 }
  0x1d   :  { %261 = vmatpush3.bf16.msra.mxu0 %v231_v41 }
  0x1e   :  { %262 = vmatprep.subr.bf16.mxu0 %v294_v2 }
  0x21   :  { %263 = vmatpush3.bf16.msra.mxu0 %v230_v44 }
  0x24   :  { %265 = vmatmul.mubr.bf16.vlgmr.msra.gmra.mxu0 %v62_v46 }
  0xe4   :  { %v194_v47 = vpop.f32.mrf.mxu0 }
  0xe5   :  { %v213_v50 = vadd.f32 %v238_v48, %v194_v47 }
  0xe6   :  { %v266_v49 = vpop.f32.mrf.mxu0 }
  0xe7   :  { %v214_v52 = vmax.f32 %v213_v50, 0.0 }
  0xe8   :  { %v197_v51 = vpop.f32.mrf.mxu0 }
  0xe9   :  { %215 = vst [vmem:[#allocation2] sm:$0xff] %v214_v52 }
  0xea   :  { %v267_v53 = vpop.f32.mrf.mxu0 }
  0xeb   :  { %283 = shalt.err (!%p280_p4)
}
  0xec   :  { %225 = dma.vmem_to_hbm [thread:$0]  %s223_s21, 128, %s418_s3, [#allocation3]  }
  0xed   :  { %292 = dma.done.wait [#allocation3], 128  }
  0xee   :  { %293 = vsyncadd [#allocation3], 4294967168 }
  0xef   :  { %229 = vsyncpa [#allocation3], 1 }

</bundles_post_ra>
